<compile_context>
chip_gen: v6e
topology: v6e:2x2x1
jax: 0.10.0
libtpu: 0.0.40
codegen_flags: <defaults>
</compile_context>

<pallas_src>
import jax
import jax.numpy as jnp
from jax.experimental import pallas as pl
from jax.experimental.pallas import tpu as pltpu

D_IN, H1, H2 = 784, 512, 256
W3_ROWS = 8      # sublane-aligned padding of the 1-wide head (row 0 is live)
TB_MAX = 512     # max batch rows per grid step


def _cdiv(a, b):
    return (a + b - 1) // b


def _round_up(n, m):
    return _cdiv(n, m) * m


def _choose_tiles(B):
    """Return (tb, num_tiles, B_pad) for a batch of B rows."""
    num_tiles = _cdiv(B, TB_MAX)
    # v7x megacore: keep >= 2 grid steps when each tile still gets >=128 real
    # rows of work; harmless (just two smaller tiles) on v5e / v6e.
    if num_tiles == 1 and B >= 256:
        num_tiles = 2
    if num_tiles == 1:
        tb = _round_up(B, 8)                      # block == full array
    else:
        tb = _round_up(_cdiv(B, num_tiles), 128)  # balanced, lane-aligned tiles
    return tb, num_tiles, tb * num_tiles


def discriminator_kernel(x_ref, w1_ref, b1_ref, w2_ref, b2_ref, w3r_ref, b3_ref,
                         o_ref):
    # f32 -> bf16 cast on the VPU (hides under the MXU); x is read as f32.
    xb = x_ref[...].astype(jnp.bfloat16)

    # ---- Linear(784, 512) + ReLU (f32 MXU accumulation) ----
    h1 = jnp.dot(xb, w1_ref[...], preferred_element_type=jnp.float32)
    h1 = jnp.maximum(h1 + b1_ref[...], 0.0).astype(jnp.bfloat16)

    # ---- Linear(512, 256) + ReLU ----
    h2 = jnp.dot(h1, w2_ref[...], preferred_element_type=jnp.float32)
    h2 = jnp.maximum(h2 + b2_ref[...], 0.0).astype(jnp.bfloat16)

    # ---- Linear(256, 1) + Sigmoid, computed transposed so the single live
    # logit column lands lane-dense: [8, H2] x [tb, H2]^T -> [8, tb]; row 0 is
    # the real logit row (rows 1..7 of w3r are zero padding).
    logits = jnp.einsum("ok,mk->om", w3r_ref[...], h2,
                        preferred_element_type=jnp.float32)      # [8, tb]
    row = logits[:1, :] + b3_ref[...]                            # [1, tb]
    # sigmoid = 1 / (1 + exp(-x)): exp + approx reciprocal, both on the EUP.
    sig = pl.reciprocal(1.0 + jnp.exp(-row), approx=True)
    o_ref[...] = sig[None]                                       # (1, 1, tb)


def prepare_params(params):
    """One-time conversion: bf16 weights + sublane-padded transposed head."""
    w3r = jnp.zeros((W3_ROWS, H2), jnp.float32).at[0, :].set(params["w3"][:, 0])
    return dict(
        w1=params["w1"].astype(jnp.bfloat16),
        b1=params["b1"].astype(jnp.float32),
        w2=params["w2"].astype(jnp.bfloat16),
        b2=params["b2"].astype(jnp.float32),
        w3r=w3r.astype(jnp.bfloat16),
        b3=params["b3"].astype(jnp.float32),     # (1, 1)
    )


def discriminator_forward(x, prep):
    """x: [B, 784] float32. prep: output of prepare_params. Returns [B, 1] f32."""
    B = x.shape[0]
    tb, num_tiles, B_pad = _choose_tiles(B)
    if B_pad != B:
        x = jnp.pad(x, ((0, B_pad - B), (0, 0)))

    w1, b1 = prep["w1"], prep["b1"]
    w2, b2 = prep["w2"], prep["b2"]
    w3r, b3 = prep["w3r"], prep["b3"]

    flops = 2 * B_pad * (D_IN * H1 + H1 * H2 + H2 * W3_ROWS)
    bytes_accessed = (
        B_pad * D_IN * 4                                       # x (f32)
        + (D_IN * H1 + H1 * H2 + W3_ROWS * H2) * 2             # weights (bf16)
        + (H1 + H2 + 1) * 4                                    # biases (f32)
        + B_pad * 4                                            # output row (f32)
    )

    resident = dict(pipeline_mode=pl.Buffered(1))  # weights never change -> 1 buffer

    out = pl.pallas_call(
        discriminator_kernel,
        out_shape=jax.ShapeDtypeStruct((num_tiles, 1, tb), jnp.float32),
        grid_spec=pltpu.PrefetchScalarGridSpec(
            num_scalar_prefetch=0,
            grid=(num_tiles,),
            in_specs=[
                pl.BlockSpec((tb, D_IN), lambda i: (i, 0)),                # x tile
                pl.BlockSpec((D_IN, H1), lambda i: (0, 0), **resident),    # w1
                pl.BlockSpec((1, H1), lambda i: (0, 0), **resident),       # b1
                pl.BlockSpec((H1, H2), lambda i: (0, 0), **resident),      # w2
                pl.BlockSpec((1, H2), lambda i: (0, 0), **resident),       # b2
                pl.BlockSpec((W3_ROWS, H2), lambda i: (0, 0), **resident),  # w3 (row form)
                pl.BlockSpec((1, 1), lambda i: (0, 0), **resident),        # b3
            ],
            out_specs=pl.BlockSpec((1, 1, tb), lambda i: (i, 0, 0)),
        ),
        compiler_params=pltpu.CompilerParams(
            dimension_semantics=("parallel",)),
        cost_estimate=pl.CostEstimate(
            flops=flops,
            transcendentals=B_pad,
            bytes_accessed=bytes_accessed),
    )(x, w1, b1, w2, b2, w3r, b3)

    # (num_tiles, 1, tb) flattens to batch order; slice off padded rows.
    return out.reshape(B_pad, 1)[:B]


def init_params(key):
    """Deterministic init mimicking nn.Linear default (uniform +/- 1/sqrt(in))."""
    ks = jax.random.split(key, 6)

    def lin(kw, kb, fan_in, fan_out):
        bound = 1.0 / jnp.sqrt(fan_in)
        w = jax.random.uniform(kw, (fan_in, fan_out), jnp.float32, -bound, bound)
        b = jax.random.uniform(kb, (1, fan_out), jnp.float32, -bound, bound)
        return w, b

    w1, b1 = lin(ks[0], ks[1], D_IN, H1)
    w2, b2 = lin(ks[2], ks[3], H1, H2)
    w3, b3 = lin(ks[4], ks[5], H2, 1)
    return dict(w1=w1, b1=b1, w2=w2, b2=b2, w3=w3, b3=b3)


def _reference(x, params, prep):
    """JAX reference with matched bf16 weight/activation quantization."""
    xb = x.astype(jnp.bfloat16)
    h1 = jnp.dot(xb, prep["w1"], preferred_element_type=jnp.float32) + prep["b1"]
    h1 = jnp.maximum(h1, 0.0).astype(jnp.bfloat16)
    h2 = jnp.dot(h1, prep["w2"], preferred_element_type=jnp.float32) + prep["b2"]
    h2 = jnp.maximum(h2, 0.0).astype(jnp.bfloat16)
    w3b = params["w3"].astype(jnp.bfloat16)
    logits = jnp.dot(h2, w3b, preferred_element_type=jnp.float32) + params["b3"]
    return jax.nn.sigmoid(logits)


if __name__ == "__main__":
    key = jax.random.PRNGKey(0)
    k_param, k_x, k_x2 = jax.random.split(key, 3)

    params = init_params(k_param)
    prep = prepare_params(params)  # bf16 / row-form weights built once

    # Small batch of 8 flattened 28x28 images (single-tile path).
    x = jax.random.normal(k_x, (8, D_IN), jnp.float32)
    out = jax.block_until_ready(discriminator_forward(x, prep))
    ref = _reference(x, params, prep)
    assert out.shape == (8, 1)
    assert jnp.allclose(out, ref, atol=2e-3), "mismatch vs reference (B=8)"

    # Exercise the multi-tile / padded path (B=300 -> 2 balanced tiles of 256).
    x2 = jax.random.normal(k_x2, (300, D_IN), jnp.float32)
    out2 = jax.block_until_ready(discriminator_forward(x2, prep))
    ref2 = _reference(x2, params, prep)
    assert out2.shape == (300, 1)
    assert jnp.allclose(out2, ref2, atol=2e-3), "mismatch vs reference (B=300)"

    print("KERNEL_OK")
</pallas_src>

<mosaic_0001>
module attributes {stable_mosaic.version = 11 : i64} {
  func.func @discriminator_kernel(%arg0: i32, %arg1: memref<8x784xf32, #tpu.memory_space<vmem>>, %arg2: memref<784x512xbf16, #tpu.memory_space<vmem>>, %arg3: memref<1x512xf32, #tpu.memory_space<vmem>>, %arg4: memref<512x256xbf16, #tpu.memory_space<vmem>>, %arg5: memref<1x256xf32, #tpu.memory_space<vmem>>, %arg6: memref<8x256xbf16, #tpu.memory_space<vmem>>, %arg7: memref<1x1xf32, #tpu.memory_space<vmem>>, %arg8: memref<1x1x8xf32, #tpu.memory_space<vmem>>) attributes {dimension_semantics = [#tpu.dimension_semantics<parallel>], iteration_bounds = array<i64: 1>, scalar_prefetch = 0 : i64, scratch_operands = 0 : i64, tpu.core_type = #tpu.core_type<tc>, window_params = [{transform_indices = @transform_0, window_bounds = array<i64: 8, 784>}, {pipeline_mode = #tpu.pipeline_mode<synchronous>, transform_indices = @transform_1, window_bounds = array<i64: 784, 512>}, {pipeline_mode = #tpu.pipeline_mode<synchronous>, transform_indices = @transform_2, window_bounds = array<i64: 1, 512>}, {pipeline_mode = #tpu.pipeline_mode<synchronous>, transform_indices = @transform_3, window_bounds = array<i64: 512, 256>}, {pipeline_mode = #tpu.pipeline_mode<synchronous>, transform_indices = @transform_4, window_bounds = array<i64: 1, 256>}, {pipeline_mode = #tpu.pipeline_mode<synchronous>, transform_indices = @transform_5, window_bounds = array<i64: 8, 256>}, {pipeline_mode = #tpu.pipeline_mode<synchronous>, transform_indices = @transform_6, window_bounds = array<i64: 1, 1>}, {transform_indices = @transform_7, window_bounds = array<i64: 1, 1, 8>}]} {
    %c0 = arith.constant 0 : index
    %c0_0 = arith.constant 0 : index
    %0 = vector.load %arg1[%c0, %c0_0] : memref<8x784xf32, #tpu.memory_space<vmem>>, vector<8x784xf32>
    %1 = arith.truncf %0 : vector<8x784xf32> to vector<8x784xbf16>
    %c0_1 = arith.constant 0 : index
    %c0_2 = arith.constant 0 : index
    %2 = vector.load %arg2[%c0_1, %c0_2] : memref<784x512xbf16, #tpu.memory_space<vmem>>, vector<784x512xbf16>
    %cst = arith.constant dense<0.000000e+00> : vector<8x512xf32>
    %3 = tpu.matmul %1, %2, %cst {dimension_numbers = #tpu.dot_dimension_numbers<[1], [0], [0], [1], [0, 0, 1, 1], [], []>} : vector<8x784xbf16>, vector<784x512xbf16>, vector<8x512xf32> -> vector<8x512xf32>
    %c0_3 = arith.constant 0 : index
    %c0_4 = arith.constant 0 : index
    %4 = vector.load %arg3[%c0_3, %c0_4] : memref<1x512xf32, #tpu.memory_space<vmem>>, vector<1x512xf32>
    %5 = vector.broadcast %4 : vector<1x512xf32> to vector<8x512xf32>
    %6 = arith.addf %3, %5 : vector<8x512xf32>
    %cst_5 = arith.constant 0.000000e+00 : f32
    %7 = vector.broadcast %cst_5 : f32 to vector<8x512xf32>
    %8 = arith.maximumf %6, %7 : vector<8x512xf32>
    %9 = arith.truncf %8 : vector<8x512xf32> to vector<8x512xbf16>
    %c0_6 = arith.constant 0 : index
    %c0_7 = arith.constant 0 : index
    %10 = vector.load %arg4[%c0_6, %c0_7] : memref<512x256xbf16, #tpu.memory_space<vmem>>, vector<512x256xbf16>
    %cst_8 = arith.constant dense<0.000000e+00> : vector<8x256xf32>
    %11 = tpu.matmul %9, %10, %cst_8 {dimension_numbers = #tpu.dot_dimension_numbers<[1], [0], [0], [1], [0, 0, 1, 1], [], []>} : vector<8x512xbf16>, vector<512x256xbf16>, vector<8x256xf32> -> vector<8x256xf32>
    %c0_9 = arith.constant 0 : index
    %c0_10 = arith.constant 0 : index
    %12 = vector.load %arg5[%c0_9, %c0_10] : memref<1x256xf32, #tpu.memory_space<vmem>>, vector<1x256xf32>
    %13 = vector.broadcast %12 : vector<1x256xf32> to vector<8x256xf32>
    %14 = arith.addf %11, %13 : vector<8x256xf32>
    %cst_11 = arith.constant 0.000000e+00 : f32
    %15 = vector.broadcast %cst_11 : f32 to vector<8x256xf32>
    %16 = arith.maximumf %14, %15 : vector<8x256xf32>
    %17 = arith.truncf %16 : vector<8x256xf32> to vector<8x256xbf16>
    %c0_12 = arith.constant 0 : index
    %c0_13 = arith.constant 0 : index
    %18 = vector.load %arg6[%c0_12, %c0_13] : memref<8x256xbf16, #tpu.memory_space<vmem>>, vector<8x256xbf16>
    "tpu.trace_start"() <{level = 10 : i32, message = "ok,mk->om"}> : () -> ()
    %cst_14 = arith.constant dense<0.000000e+00> : vector<8x8xf32>
    %19 = tpu.matmul %18, %17, %cst_14 {dimension_numbers = #tpu.dot_dimension_numbers<[1], [1], [0], [0], [0, 0, 1, 0], [], []>} : vector<8x256xbf16>, vector<8x256xbf16>, vector<8x8xf32> -> vector<8x8xf32>
    "tpu.trace_stop"() : () -> ()
    %20 = vector.extract_strided_slice %19 {offsets = [0, 0], sizes = [1, 8], strides = [1, 1]} : vector<8x8xf32> to vector<1x8xf32>
    %c0_15 = arith.constant 0 : index
    %c0_16 = arith.constant 0 : index
    %21 = vector.load %arg7[%c0_15, %c0_16] : memref<1x1xf32, #tpu.memory_space<vmem>>, vector<1x1xf32>
    %22 = vector.broadcast %21 : vector<1x1xf32> to vector<1x8xf32>
    %23 = arith.addf %20, %22 : vector<1x8xf32>
    %cst_17 = arith.constant 0.000000e+00 : f32
    %24 = vector.broadcast %cst_17 : f32 to vector<1x8xf32>
    %25 = arith.subf %24, %23 : vector<1x8xf32>
    %26 = math.exp %25 : vector<1x8xf32>
    %cst_18 = arith.constant 1.000000e+00 : f32
    %27 = vector.broadcast %cst_18 : f32 to vector<1x8xf32>
    %28 = arith.addf %27, %26 : vector<1x8xf32>
    %29 = tpu.reciprocal %28 {approx = true} : vector<1x8xf32> -> vector<1x8xf32>
    %30 = vector.shape_cast %29 : vector<1x8xf32> to vector<1x1x8xf32>
    %c0_19 = arith.constant 0 : index
    %c0_20 = arith.constant 0 : index
    %c0_21 = arith.constant 0 : index
    %31 = vector.load %arg8[%c0_19, %c0_20, %c0_21] : memref<1x1x8xf32, #tpu.memory_space<vmem>>, vector<1x1x8xf32>
    tpu.vector_store %arg8[%c0_19, %c0_20, %c0_21], %30 {strides = array<i32>} : memref<1x1x8xf32, #tpu.memory_space<vmem>>, vector<1x1x8xf32>,
    return
  }
  func.func @transform_0(%arg0: i32) -> (i32, i32) {
    %c0_i32 = arith.constant 0 : i32
    %c0_i32_0 = arith.constant 0 : i32
    return %arg0, %c0_i32 : i32, i32
  }
  func.func @transform_1(%arg0: i32) -> (i32, i32) {
    %c0_i32 = arith.constant 0 : i32
    %c0_i32_0 = arith.constant 0 : i32
    %c0_i32_1 = arith.constant 0 : i32
    return %c0_i32, %c0_i32_0 : i32, i32
  }
  func.func @transform_2(%arg0: i32) -> (i32, i32) {
    %c0_i32 = arith.constant 0 : i32
    %c0_i32_0 = arith.constant 0 : i32
    %c0_i32_1 = arith.constant 0 : i32
    return %c0_i32, %c0_i32_0 : i32, i32
  }
  func.func @transform_3(%arg0: i32) -> (i32, i32) {
    %c0_i32 = arith.constant 0 : i32
    %c0_i32_0 = arith.constant 0 : i32
    %c0_i32_1 = arith.constant 0 : i32
    return %c0_i32, %c0_i32_0 : i32, i32
  }
  func.func @transform_4(%arg0: i32) -> (i32, i32) {
    %c0_i32 = arith.constant 0 : i32
    %c0_i32_0 = arith.constant 0 : i32
    %c0_i32_1 = arith.constant 0 : i32
    return %c0_i32, %c0_i32_0 : i32, i32
  }
  func.func @transform_5(%arg0: i32) -> (i32, i32) {
    %c0_i32 = arith.constant 0 : i32
    %c0_i32_0 = arith.constant 0 : i32
    %c0_i32_1 = arith.constant 0 : i32
    return %c0_i32, %c0_i32_0 : i32, i32
  }
  func.func @transform_6(%arg0: i32) -> (i32, i32) {
    %c0_i32 = arith.constant 0 : i32
    %c0_i32_0 = arith.constant 0 : i32
    %c0_i32_1 = arith.constant 0 : i32
    return %c0_i32, %c0_i32_0 : i32, i32
  }
  func.func @transform_7(%arg0: i32) -> (i32, i32, i32) {
    %c0_i32 = arith.constant 0 : i32
    %c0_i32_0 = arith.constant 0 : i32
    %c0_i32_1 = arith.constant 0 : i32
    return %arg0, %c0_i32, %c0_i32_0 : i32, i32, i32
  }
}

</mosaic_0001>

<bundles_post_ra>
// kernel: tpu_custom_call.1
= control target key start
LH: loop header
LB: loop body
LE: loop exit
PB: predicated region body
PF: predicated region fallthrough
CT: control target
= control target key end

     0   :  { %s3099_s0 = inlined_call_operand.hbm [shape: f32[8,784], index: 0, kind: input, shape index: {}]   ;;  %s3100_s1 = inlined_call_operand.hbm [shape: bf16[784,512], index: 1, kind: input, shape index: {}]   ;;  %s3101_s2 = inlined_call_operand.hbm [shape: f32[1,512], index: 2, kind: input, shape index: {}]   ;;  %s3102_s3 = inlined_call_operand.hbm [shape: bf16[512,256], index: 3, kind: input, shape index: {}]   ;;  %s3103_s4 = inlined_call_operand.vmem [shape: f32[1,256], index: 4, kind: input, shape index: {}]   ;;  %s3104_s5 = inlined_call_operand.vmem [shape: bf16[8,256], index: 5, kind: input, shape index: {}]   ;;  %s3105_s6 = inlined_call_operand.<no memory space> [shape: f32[1,1], index: 6, kind: input, shape index: {}]   ;;  %s3106_s7 = inlined_call_operand.hbm [shape: f32[1,1,8], index: 7, kind: output, shape index: {}]  }
   0x1   :  { %v12_v0 = vstv %s3105_s6 }
   0x2   :  { %13 = vst [vmem:[#allocation2] sm:$0x1] %v12_v0 }
   0x3   :  { %14 = vsyncpa [#allocation4], 0 }
   0x4   :  { %15 = vsyncpa [#allocation7], 0 }
   0x5   :  { %16 = vsyncpa [#allocation10], 0 }
   0x6   :  { %17 = vsyncpa [#allocation5], 0  ;;  %s2977_s26 = smov [#allocation6]  }
   0x7   :  { %s33_s27 = sshll.u32 %s2977_s26, 4  ;;  %s34_s27 = int_to_ptr.vmem [resolvable:$true] %s33_s27 }
   0x8   :  { %s2877_s28 = scalar_lea.vmem %s34_s27, 25088  ;;  %p2882_p1 = scmp.lt.s32.totalorder %s34_s27, %s34_s27 }
   0x9   :  { %p2878_p0 = scmp.ne.s32.totalorder %s34_s27, %s2877_s28  ;;  %p2883_p2 = scmp.lt.s32.totalorder %s2877_s28, %s2877_s28 }
   0xb   :  { %p2884_p3 = por %p2883_p2, %p2882_p1 }
   0xd   :  { %p2885_p4 = pnand %p2884_p3, %p2878_p0 }
   0xf   :  { %2888 = shalt.err (!%p2885_p4)
}
  0x10   :  { %s2978_s29 = smov 256   ;;  %s2979_s30 = smov 16  }
  0x11   :  { %39 = dma.hbm_to_vmem [thread:$0]  %s3100_s1, 25088, %s34_s27, [#allocation7], %s2978_s29, %s2978_s29, %s2979_s30  }
  0x12   :  { %s2980_s6 = smov [#allocation3]   ;;  %s2981_s11 = smov [#allocation8]  }
  0x13   :  { %s24_s10 = sshll.u32 %s2980_s6, 4  ;;  %s46_s12 = sshll.u32 %s2981_s11, 4  ;;  %s25_s10 = int_to_ptr.vmem [resolvable:$true] %s24_s10  ;;  %s47_s12 = int_to_ptr.vmem [resolvable:$true] %s46_s12 }
  0x14   :  { %s2897_s13 = scalar_lea.vmem %s25_s10, 896  ;;  %p2902_p6 = scmp.lt.s32.totalorder %s25_s10, %s25_s10 }
  0x15   :  { %p2898_p5 = scmp.ne.s32.totalorder %s25_s10, %s2897_s13  ;;  %p2903_p7 = scmp.lt.s32.totalorder %s2897_s13, %s2897_s13 }
  0x17   :  { %p2904_p8 = por %p2903_p7, %p2902_p6 }
  0x19   :  { %p2905_p9 = pnand %p2904_p8, %p2898_p5 }
  0x1b   :  { %2908 = shalt.err (!%p2905_p9)
}
  0x1c   :  { %27 = dma.hbm_to_vmem [thread:$0]  %s3099_s0, 896, %s25_s10, [#allocation4]  }
  0x1d   :  { %s2917_s16 = scalar_lea.vmem %s47_s12, 64  ;;  %p2922_p11 = scmp.lt.s32.totalorder %s47_s12, %s47_s12 }
  0x1e   :  { %p2918_p10 = scmp.ne.s32.totalorder %s47_s12, %s2917_s16  ;;  %p2923_p12 = scmp.lt.s32.totalorder %s2917_s16, %s2917_s16 }
  0x20   :  { %p2924_p13 = por %p2923_p12, %p2922_p11 }
  0x22   :  { %p2925_p0 = pnand %p2924_p13, %p2918_p10 }
  0x24   :  { %2928 = shalt.err (!%p2925_p0)
}
  0x25   :  { %49 = dma.hbm_to_vmem [thread:$0]  %s3101_s2, 64, %s47_s12, [#allocation7]  }
  0x26   :  { %s2982_s18 = smov [#allocation9]  }
  0x27   :  { %s55_s19 = sshll.u32 %s2982_s18, 4  ;;  %s56_s19 = int_to_ptr.vmem [resolvable:$true] %s55_s19 }
  0x28   :  { %s2937_s20 = scalar_lea.vmem %s56_s19, 8192  ;;  %p2942_p2 = scmp.lt.s32.totalorder %s56_s19, %s56_s19 }
  0x29   :  { %p2938_p1 = scmp.ne.s32.totalorder %s56_s19, %s2937_s20  ;;  %p2943_p3 = scmp.lt.s32.totalorder %s2937_s20, %s2937_s20 }
  0x2b   :  { %p2944_p4 = por %p2943_p3, %p2942_p2 }
  0x2d   :  { %p2945_p5 = pnand %p2944_p4, %p2938_p1 }
  0x2f   :  { %2948 = shalt.err (!%p2945_p5)
}
  0x30   :  { %s2983_s0 = smov 128   ;;  %s2984_s21 = smov 8  }
  0x31   :  { %61 = dma.hbm_to_vmem [thread:$0]  %s3102_s3, 8192, %s56_s19, [#allocation10], %s2983_s0, %s2983_s0, %s2984_s21  }
  0x32   :  { %2969 = dma.done.wait [#allocation4], 896  }
  0x33   :  { %2970 = vsyncadd [#allocation4], 4294966400 }
  0x34   :  { %2971 = dma.done.wait [#allocation7], 25152  }
  0x35   :  { %2972 = vsyncadd [#allocation7], 4294942144 }
  0x36   :  { %2973 = dma.done.wait [#allocation10], 8192  }
  0x37   :  { %2974 = vsyncadd [#allocation10], 4294959104  ;;  %v2985_v1 = vmov 0   ;;  %v2473_v2 = vld [vmem:[#allocation6 + $0xe4] ss:$16 sps:$4 sm:$0xff]   ;;  %vm1293_vm0 = vcmask 130048  }
  0x38   :  { %2472 = vset.pattern.permute.xlu0 %v2985_v1  ;;  %v2475_v3 = vld [vmem:[#allocation6 + $0x2e4] ss:$16 sps:$4 sm:$0xff]   ;;  %1297 = vmatprep.subr.bf16.mxu0 %v2473_v2  ;;  %v2477_v4 = vld [vmem:[#allocation6 + $0xe0] ss:$16 sps:$4 sm:$0xff]   ;;  %vm2179_vm1 = vcmask 57344  }
  0x39   :  { %v2478_v5 = vld [vmem:[#allocation6 + $0x2e0] ss:$16 sps:$4 sm:$0xff]   ;;  %1338 = vmatprep.subr.bf16.mxu1 %v2475_v3  ;;  %v2479_v6 = vld [vmem:[#allocation6 + $0xc4] ss:$16 sps:$4 sm:$0xff]   ;;  %1298 = vmatpush1.bf16.msra.mxu0 %v2477_v4 }
  0x3a   :  { %1339 = vmatpush1.bf16.msra.mxu1 %v2478_v5  ;;  %v2481_v7 = vld [vmem:[#allocation6 + $0x2c4] ss:$16 sps:$4 sm:$0xff]   ;;  %v2483_v8 = vld [vmem:[#allocation6 + $0xc0] ss:$16 sps:$4 sm:$0xff]   ;;  %1299 = vmatprep.subr.bf16.mxu0 %v2479_v6 }
  0x3b   :  { %v2484_v9 = vld [vmem:[#allocation6 + $0x2c0] ss:$16 sps:$4 sm:$0xff]   ;;  %1340 = vmatprep.subr.bf16.mxu1 %v2481_v7  ;;  %v2485_v10 = vld [vmem:[#allocation6 + $0xa4] ss:$16 sps:$4 sm:$0xff]   ;;  %v81_v7 = vld [vmem:[#allocation3] sm:$0xff] }
  0x3c   :  { %v2487_v11 = vld [vmem:[#allocation6 + $0x2a4] ss:$16 sps:$4 sm:$0xff]   ;;  %v2489_v12 = vld [vmem:[#allocation6 + $0xa0] ss:$16 sps:$4 sm:$0xff]  }
  0x3d   :  { %v2490_v13 = vld [vmem:[#allocation6 + $0x2a0] ss:$16 sps:$4 sm:$0xff]   ;;  %1300 = vmatpush1.bf16.msra.mxu0 %v2483_v8  ;;  %v2491_v14 = vld [vmem:[#allocation6 + $0x84] ss:$16 sps:$4 sm:$0xff]   ;;  %v83_v8 = vld [vmem:[#allocation3 + $0x10] sm:$0xff] }
  0x3e   :  { %1341 = vmatpush1.bf16.msra.mxu1 %v2484_v9  ;;  %1301 = vmatprep.subr.bf16.mxu0 %v2485_v10  ;;  %v2493_v15 = vld [vmem:[#allocation6 + $0x284] ss:$16 sps:$4 sm:$0xff]   ;;  %v2495_v16 = vld [vmem:[#allocation6 + $0x80] ss:$16 sps:$4 sm:$0xff]  }
  0x3f   :  { %1342 = vmatprep.subr.bf16.mxu1 %v2487_v11  ;;  %v2496_v17 = vld [vmem:[#allocation6 + $0x280] ss:$16 sps:$4 sm:$0xff]   ;;  %v2497_v18 = vld [vmem:[#allocation6 + $0x64] ss:$16 sps:$4 sm:$0xff]   ;;  %v3049_v11 = vpack.c.bf16 %v81_v7, %v81_v7  ;;  %v2652_v7 = vld [vmem:[#allocation6 + $0x16c] ss:$16 sps:$4 sm:$0xff]  }
  0x40   :  { %v2499_v19 = vld [vmem:[#allocation6 + $0x264] ss:$16 sps:$4 sm:$0xff]   ;;  %v2501_v20 = vld [vmem:[#allocation6 + $0x60] ss:$16 sps:$4 sm:$0xff]  }
  0x41   :  { %1302 = vmatpush1.bf16.msra.mxu0 %v2489_v12  ;;  %v2502_v21 = vld [vmem:[#allocation6 + $0x260] ss:$16 sps:$4 sm:$0xff]   ;;  %v2503_v22 = vld [vmem:[#allocation6 + $0x44] ss:$16 sps:$4 sm:$0xff]   ;;  %v3051_v12 = vpack.c.bf16 %v83_v8, %v83_v8 }
  0x42   :  { %1343 = vmatpush1.bf16.msra.mxu1 %v2490_v13  ;;  %1303 = vmatprep.subr.bf16.mxu0 %v2491_v14  ;;  %v2505_v23 = vld [vmem:[#allocation6 + $0x244] ss:$16 sps:$4 sm:$0xff]   ;;  %v2507_v24 = vld [vmem:[#allocation6 + $0x40] ss:$16 sps:$4 sm:$0xff]  }
  0x43   :  { %1344 = vmatprep.subr.bf16.mxu1 %v2493_v15  ;;  %v2508_v25 = vld [vmem:[#allocation6 + $0x240] ss:$16 sps:$4 sm:$0xff]   ;;  %v2509_v26 = vld [vmem:[#allocation6 + $0x24] ss:$16 sps:$4 sm:$0xff]  }
  0x44   :  { %v2511_v27 = vld [vmem:[#allocation6 + $0x224] ss:$16 sps:$4 sm:$0xff]   ;;  %v2513_v28 = vld [vmem:[#allocation6 + $0x20] ss:$16 sps:$4 sm:$0xff]  }
  0x45   :  { %1304 = vmatpush1.bf16.msra.mxu0 %v2495_v16  ;;  %v2514_v29 = vld [vmem:[#allocation6 + $0x220] ss:$16 sps:$4 sm:$0xff]   ;;  %v2515_v30 = vld [vmem:[#allocation6 + $0x4] ss:$16 sps:$4 sm:$0xff]   ;;  %v2580_v16 = vld [vmem:[#allocation6 + $0xec] ss:$16 sps:$4 sm:$0xff]  }
  0x46   :  { %1345 = vmatpush1.bf16.msra.mxu1 %v2496_v17  ;;  %1305 = vmatprep.subr.bf16.mxu0 %v2497_v18  ;;  %v2517_v31 = vld [vmem:[#allocation6 + $0x204] ss:$16 sps:$4 sm:$0xff]   ;;  %v2519_v32 = vld [vmem:[#allocation6] ss:$16 sps:$4 sm:$0xff]   ;;  %v87_v18 = vld [vmem:[#allocation3 + $0x30] sm:$0xff] }
  0x47   :  { %1346 = vmatprep.subr.bf16.mxu1 %v2499_v19  ;;  %v2520_v33 = vld [vmem:[#allocation6 + $0x200] ss:$16 sps:$4 sm:$0xff]   ;;  %v2521_v34 = vld [vmem:[#allocation6 + $0x1e4] ss:$16 sps:$4 sm:$0xff]  }
  0x48   :  { %v2523_v35 = vld [vmem:[#allocation6 + $0x3e4] ss:$16 sps:$4 sm:$0xff]   ;;  %v2525_v36 = vld [vmem:[#allocation6 + $0x1e0] ss:$16 sps:$4 sm:$0xff]  }
  0x49   :  { %1306 = vmatpush1.bf16.msra.mxu0 %v2501_v20  ;;  %v2526_v37 = vld [vmem:[#allocation6 + $0x3e0] ss:$16 sps:$4 sm:$0xff]   ;;  %v2527_v38 = vld [vmem:[#allocation6 + $0x1c4] ss:$16 sps:$4 sm:$0xff]   ;;  %v2578_v20 = vld [vmem:[#allocation6 + $0xe8] ss:$16 sps:$4 sm:$0xff]  }
  0x4a   :  { %1347 = vmatpush1.bf16.msra.mxu1 %v2502_v21  ;;  %1307 = vmatprep.subr.bf16.mxu0 %v2503_v22  ;;  %v2529_v39 = vld [vmem:[#allocation6 + $0x3c4] ss:$16 sps:$4 sm:$0xff]   ;;  %v2531_v40 = vld [vmem:[#allocation6 + $0x1c0] ss:$16 sps:$4 sm:$0xff]   ;;  %v3056_v21 = vpack.c.bf16 %v87_v18, %v87_v18  ;;  %v85_v18 = vld [vmem:[#allocation3 + $0x20] sm:$0xff] }
  0x4b   :  { %1348 = vmatprep.subr.bf16.mxu1 %v2505_v23  ;;  %v2532_v41 = vld [vmem:[#allocation6 + $0x3c0] ss:$16 sps:$4 sm:$0xff]   ;;  %v2533_v42 = vld [vmem:[#allocation6 + $0x1a4] ss:$16 sps:$4 sm:$0xff]   ;;  %v2586_v23 = vld [vmem:[#allocation6 + $0xcc] ss:$16 sps:$4 sm:$0xff]  }
  0x4c   :  { %v2535_v43 = vld [vmem:[#allocation6 + $0x3a4] ss:$16 sps:$4 sm:$0xff]   ;;  %v2537_v44 = vld [vmem:[#allocation6 + $0x1a0] ss:$16 sps:$4 sm:$0xff]  }
  0x4d   :  { %1308 = vmatpush1.bf16.msra.mxu0 %v2507_v24  ;;  %v2538_v45 = vld [vmem:[#allocation6 + $0x3a0] ss:$16 sps:$4 sm:$0xff]   ;;  %v2539_v46 = vld [vmem:[#allocation6 + $0x184] ss:$16 sps:$4 sm:$0xff]  }
  0x4e   :  { %1349 = vmatpush1.bf16.msra.mxu1 %v2508_v25  ;;  %1309 = vmatprep.subr.bf16.mxu0 %v2509_v26  ;;  %v2541_v47 = vld [vmem:[#allocation6 + $0x384] ss:$16 sps:$4 sm:$0xff]   ;;  %v2543_v49 = vld [vmem:[#allocation6 + $0x180] ss:$16 sps:$4 sm:$0xff]   ;;  %v2584_v25 = vld [vmem:[#allocation6 + $0xc8] ss:$16 sps:$4 sm:$0xff]  }
  0x4f   :  { %1350 = vmatprep.subr.bf16.mxu1 %v2511_v27  ;;  %v82_v48 = vld [vmem:[#allocation3 + $0x8] sm:$0xff]  ;;  %v84_v52 = vld [vmem:[#allocation3 + $0x18] sm:$0xff]  ;;  %v2592_v27 = vld [vmem:[#allocation6 + $0xac] ss:$16 sps:$4 sm:$0xff]  }
  0x50   :  { %v2544_v50 = vld [vmem:[#allocation6 + $0x380] ss:$16 sps:$4 sm:$0xff]   ;;  %v3043_v51 = vpack.c.bf16 %v82_v48, %v82_v48  ;;  %v2545_v53 = vld [vmem:[#allocation6 + $0x164] ss:$16 sps:$4 sm:$0xff]   ;;  %v3045_v54 = vpack.c.bf16 %v84_v52, %v84_v52 }
  0x51   :  { %1310 = vmatpush1.bf16.msra.mxu0 %v2513_v28  ;;  %v2547_v55 = vld [vmem:[#allocation6 + $0x364] ss:$16 sps:$4 sm:$0xff]   ;;  %v2549_v56 = vld [vmem:[#allocation6 + $0x160] ss:$16 sps:$4 sm:$0xff]  }
  0x52   :  { %1351 = vmatpush1.bf16.msra.mxu1 %v2514_v29  ;;  %1311 = vmatprep.subr.bf16.mxu0 %v2515_v30  ;;  %v2550_v57 = vld [vmem:[#allocation6 + $0x360] ss:$16 sps:$4 sm:$0xff]   ;;  %v2551_v58 = vld [vmem:[#allocation6 + $0x144] ss:$16 sps:$4 sm:$0xff]   ;;  %v2590_v29 = vld [vmem:[#allocation6 + $0xa8] ss:$16 sps:$4 sm:$0xff]  }
  0x53   :  { %1352 = vmatprep.subr.bf16.mxu1 %v2517_v31  ;;  %1329 = vmatprep.mubr.bf16.mxu0 %v3043_v51  ;;  %v2553_v59 = vld [vmem:[#allocation6 + $0x344] ss:$16 sps:$4 sm:$0xff]   ;;  %v2555_v60 = vld [vmem:[#allocation6 + $0x140] ss:$16 sps:$4 sm:$0xff]   ;;  %v2598_v31 = vld [vmem:[#allocation6 + $0x8c] ss:$16 sps:$4 sm:$0xff]  }
  0x54   :  { %1370 = vmatprep.mubr.bf16.mxu1 %v3045_v54  ;;  %v2556_v61 = vld [vmem:[#allocation6 + $0x340] ss:$16 sps:$4 sm:$0xff]   ;;  %v2557_v62 = vld [vmem:[#allocation6 + $0x124] ss:$16 sps:$4 sm:$0xff]  }
  0x55   :  { %1312 = vmatpush1.bf16.msra.mxu0 %v2519_v32  ;;  %v2559_v63 = vld [vmem:[#allocation6 + $0x324] ss:$16 sps:$4 sm:$0xff]   ;;  %v2561_v0 = vld [vmem:[#allocation6 + $0x120] ss:$16 sps:$4 sm:$0xff]  }
  0x56   :  { %1353 = vmatpush1.bf16.msra.mxu1 %v2520_v33  ;;  %1313 = vmatprep.subr.bf16.mxu0 %v2521_v34  ;;  %v2562_v2 = vld [vmem:[#allocation6 + $0x320] ss:$16 sps:$4 sm:$0xff]   ;;  %v2563_v3 = vld [vmem:[#allocation6 + $0x104] ss:$16 sps:$4 sm:$0xff]   ;;  %v2596_v33 = vld [vmem:[#allocation6 + $0x88] ss:$16 sps:$4 sm:$0xff]  }
  0x57   :  { %1354 = vmatprep.subr.bf16.mxu1 %v2523_v35  ;;  %v2565_v4 = vld [vmem:[#allocation6 + $0x304] ss:$16 sps:$4 sm:$0xff]   ;;  %v2567_v5 = vld [vmem:[#allocation6 + $0x100] ss:$16 sps:$4 sm:$0xff]   ;;  %v2604_v35 = vld [vmem:[#allocation6 + $0x6c] ss:$16 sps:$4 sm:$0xff]  }
  0x58   :  { %v2568_v6 = vld [vmem:[#allocation6 + $0x300] ss:$16 sps:$4 sm:$0xff]   ;;  %v2571_v9 = vld [vmem:[#allocation6 + $0x4e4] ss:$16 sps:$4 sm:$0xff]  }
  0x59   :  { %1314 = vmatpush2.bf16.msra.mxu0 %v2525_v36  ;;  %v2574_v10 = vld [vmem:[#allocation6 + $0x604] ss:$16 sps:$4 sm:$0xff]   ;;  %v2569_v13 = vld [vmem:[#allocation6 + $0x4e0] ss:$16 sps:$4 sm:$0xff]  }
  0x5a   :  { %1355 = vmatpush2.bf16.msra.mxu1 %v2526_v37  ;;  %1315 = vmatprep.subr.bf16.mxu0 %v2527_v38  ;;  %v2572_v14 = vld [vmem:[#allocation6 + $0x600] ss:$16 sps:$4 sm:$0xff]   ;;  %v2577_v15 = vld [vmem:[#allocation6 + $0x4c4] ss:$16 sps:$4 sm:$0xff]  }
  0x5b   :  { %1356 = vmatprep.subr.bf16.mxu1 %v2529_v39  ;;  %v2575_v17 = vld [vmem:[#allocation6 + $0x4c0] ss:$16 sps:$4 sm:$0xff]   ;;  %v2583_v19 = vld [vmem:[#allocation6 + $0x4a4] ss:$16 sps:$4 sm:$0xff]   ;;  %v2602_v39 = vld [vmem:[#allocation6 + $0x68] ss:$16 sps:$4 sm:$0xff]  }
  0x5c   :  { %v2581_v22 = vld [vmem:[#allocation6 + $0x4a0] ss:$16 sps:$4 sm:$0xff]   ;;  %v2589_v24 = vld [vmem:[#allocation6 + $0x484] ss:$16 sps:$4 sm:$0xff]  }
  0x5d   :  { %1316 = vmatpush2.bf16.msra.mxu0 %v2531_v40  ;;  %v2587_v26 = vld [vmem:[#allocation6 + $0x480] ss:$16 sps:$4 sm:$0xff]   ;;  %v2595_v28 = vld [vmem:[#allocation6 + $0x464] ss:$16 sps:$4 sm:$0xff]  }
  0x5e   :  { %1357 = vmatpush2.bf16.msra.mxu1 %v2532_v41  ;;  %1317 = vmatprep.subr.bf16.mxu0 %v2533_v42  ;;  %v2593_v30 = vld [vmem:[#allocation6 + $0x460] ss:$16 sps:$4 sm:$0xff]   ;;  %v2601_v32 = vld [vmem:[#allocation6 + $0x444] ss:$16 sps:$4 sm:$0xff]   ;;  %v2610_v41 = vld [vmem:[#allocation6 + $0x4c] ss:$16 sps:$4 sm:$0xff]  }
  0x5f   :  { %1358 = vmatprep.subr.bf16.mxu1 %v2535_v43  ;;  %v2599_v34 = vld [vmem:[#allocation6 + $0x440] ss:$16 sps:$4 sm:$0xff]   ;;  %v2607_v36 = vld [vmem:[#allocation6 + $0x424] ss:$16 sps:$4 sm:$0xff]   ;;  %v2608_v43 = vld [vmem:[#allocation6 + $0x48] ss:$16 sps:$4 sm:$0xff]  }
  0x60   :  { %v86_v37 = vld [vmem:[#allocation3 + $0x28] sm:$0xff] }
  0x61   :  { %1318 = vmatpush2.bf16.msra.mxu0 %v2537_v44  ;;  %v3061_v38 = vpack.c.bf16 %v86_v37, %v86_v37  ;;  %v2605_v40 = vld [vmem:[#allocation6 + $0x420] ss:$16 sps:$4 sm:$0xff]   ;;  %v2613_v42 = vld [vmem:[#allocation6 + $0x404] ss:$16 sps:$4 sm:$0xff]   ;;  %v2691_v37 = vld [vmem:[#allocation6 + $0x26c] ss:$16 sps:$4 sm:$0xff]  }
  0x62   :  { %1359 = vmatpush2.bf16.msra.mxu1 %v2538_v45  ;;  %1319 = vmatprep.subr.bf16.mxu0 %v2539_v46  ;;  %v2611_v44 = vld [vmem:[#allocation6 + $0x400] ss:$16 sps:$4 sm:$0xff]   ;;  %v2616_v45 = vld [vmem:[#allocation6 + $0x2c] ss:$16 sps:$4 sm:$0xff]   ;;  %v2619_v46 = vld [vmem:[#allocation6 + $0x5e4] ss:$16 sps:$4 sm:$0xff]  }
  0x63   :  { %1360 = vmatprep.subr.bf16.mxu1 %v2541_v47  ;;  %v2614_v47 = vld [vmem:[#allocation6 + $0x28] ss:$16 sps:$4 sm:$0xff]   ;;  %v2617_v48 = vld [vmem:[#allocation6 + $0x5e0] ss:$16 sps:$4 sm:$0xff]   ;;  %v2655_v8 = vld [vmem:[#allocation6 + $0x524] ss:$16 sps:$4 sm:$0xff]  }
  0x64   :  { %v2623_v52 = vld [vmem:[#allocation6 + $0x5c0] ss:$16 sps:$4 sm:$0xff]  }
  0x65   :  { %1320 = vmatpush2.bf16.msra.mxu0 %v2543_v49  ;;  %v2622_v49 = vld [vmem:[#allocation6 + $0xc] ss:$16 sps:$4 sm:$0xff]  }
  0x66   :  { %1361 = vmatpush2.bf16.msra.mxu1 %v2544_v50  ;;  %1321 = vmatprep.subr.bf16.mxu0 %v2545_v53  ;;  %v2625_v50 = vld [vmem:[#allocation6 + $0x5c4] ss:$16 sps:$4 sm:$0xff]   ;;  %v2628_v53 = vld [vmem:[#allocation6 + $0x1ec] ss:$16 sps:$4 sm:$0xff]  }
  0x67   :  { %1362 = vmatprep.subr.bf16.mxu1 %v2547_v55  ;;  %v2631_v55 = vld [vmem:[#allocation6 + $0x5a4] ss:$16 sps:$4 sm:$0xff]  }
  0x69   :  { %1322 = vmatpush2.bf16.msra.mxu0 %v2549_v56  ;;  %v2626_v56 = vld [vmem:[#allocation6 + $0x1e8] ss:$16 sps:$4 sm:$0xff]  }
  0x6a   :  { %1363 = vmatpush2.bf16.msra.mxu1 %v2550_v57  ;;  %1323 = vmatprep.subr.bf16.mxu0 %v2551_v58  ;;  %v2629_v57 = vld [vmem:[#allocation6 + $0x5a0] ss:$16 sps:$4 sm:$0xff]   ;;  %v2634_v58 = vld [vmem:[#allocation6 + $0x1cc] ss:$16 sps:$4 sm:$0xff]  }
  0x6b   :  { %1364 = vmatprep.subr.bf16.mxu1 %v2553_v59  ;;  %v2637_v59 = vld [vmem:[#allocation6 + $0x584] ss:$16 sps:$4 sm:$0xff]  }
  0x6d   :  { %1324 = vmatpush2.bf16.msra.mxu0 %v2555_v60  ;;  %v2632_v60 = vld [vmem:[#allocation6 + $0x1c8] ss:$16 sps:$4 sm:$0xff]  }
  0x6e   :  { %1365 = vmatpush2.bf16.msra.mxu1 %v2556_v61  ;;  %1325 = vmatprep.subr.bf16.mxu0 %v2557_v62  ;;  %v2635_v61 = vld [vmem:[#allocation6 + $0x580] ss:$16 sps:$4 sm:$0xff]   ;;  %v2640_v62 = vld [vmem:[#allocation6 + $0x1ac] ss:$16 sps:$4 sm:$0xff]  }
  0x6f   :  { %1366 = vmatprep.subr.bf16.mxu1 %v2559_v63  ;;  %v2643_v63 = vld [vmem:[#allocation6 + $0x564] ss:$16 sps:$4 sm:$0xff]  }
  0x71   :  { %1326 = vmatpush2.bf16.msra.mxu0 %v2561_v0  ;;  %v2638_v0 = vld [vmem:[#allocation6 + $0x1a8] ss:$16 sps:$4 sm:$0xff]  }
  0x72   :  { %1367 = vmatpush2.bf16.msra.mxu1 %v2562_v2  ;;  %1327 = vmatprep.subr.bf16.mxu0 %v2563_v3  ;;  %v2641_v2 = vld [vmem:[#allocation6 + $0x560] ss:$16 sps:$4 sm:$0xff]   ;;  %v2646_v3 = vld [vmem:[#allocation6 + $0x18c] ss:$16 sps:$4 sm:$0xff]  }
  0x73   :  { %1368 = vmatprep.subr.bf16.mxu1 %v2565_v4  ;;  %v2649_v4 = vld [vmem:[#allocation6 + $0x544] ss:$16 sps:$4 sm:$0xff]  }
  0x75   :  { %1328 = vmatpush2.bf16.msra.mxu0 %v2567_v5  ;;  %v2644_v5 = vld [vmem:[#allocation6 + $0x188] ss:$16 sps:$4 sm:$0xff]  }
  0x76   :  { %1369 = vmatpush2.bf16.msra.mxu1 %v2568_v6  ;;  %1379 = vmatprep.subr.bf16.mxu0 %v2571_v9  ;;  %v2647_v6 = vld [vmem:[#allocation6 + $0x540] ss:$16 sps:$4 sm:$0xff]   ;;  %v2650_v9 = vld [vmem:[#allocation6 + $0x168] ss:$16 sps:$4 sm:$0xff]  }
  0x77   :  { %1434 = vmatprep.subr.bf16.mxu1 %v2574_v10  ;;  %v2653_v10 = vld [vmem:[#allocation6 + $0x520] ss:$16 sps:$4 sm:$0xff]  }
  0x78   :  { %1330 = vmatmul.mubr.bf16.vlgmr.msra.gmra.mxu0 %v3049_v11 }
  0x79   :  { %1371 = vmatmul.mubr.bf16.vlgmr.msra.gmra.mxu1 %v3051_v12  ;;  %1380 = vmatpush1.bf16.msra.mxu0 %v2569_v13  ;;  %v2658_v13 = vld [vmem:[#allocation6 + $0x14c] ss:$16 sps:$4 sm:$0xff]  }
  0x7a   :  { %1435 = vmatpush1.bf16.msra.mxu1 %v2572_v14  ;;  %1381 = vmatprep.subr.bf16.mxu0 %v2577_v15  ;;  %v2661_v14 = vld [vmem:[#allocation6 + $0x504] ss:$16 sps:$4 sm:$0xff]   ;;  %v2656_v15 = vld [vmem:[#allocation6 + $0x148] ss:$16 sps:$4 sm:$0xff]  }
  0x7b   :  { %1452 = vmatprep.mubr.bf16.mxu1 %v2985_v1  ;;  %1461 = vmatprep.subr.bf16.mxu1 %v2580_v16  ;;  %v2659_v16 = vld [vmem:[#allocation6 + $0x500] ss:$16 sps:$4 sm:$0xff]  }
  0x7c   :  { %1411 = vmatprep.mubr.bf16.mxu0 %v3061_v38 }
  0x7d   :  { %1382 = vmatpush1.bf16.msra.mxu0 %v2575_v17  ;;  %v2664_v17 = vld [vmem:[#allocation6 + $0x12c] ss:$16 sps:$4 sm:$0xff]  }
  0x7e   :  { %1383 = vmatprep.subr.bf16.mxu0 %v2583_v19  ;;  %v2667_v19 = vld [vmem:[#allocation6 + $0x2ec] ss:$16 sps:$4 sm:$0xff]  }
  0x81   :  { %2394 = vmatmul.mubr.msk.bf16.vlgmr.msra.gmra.mxu1 %vm1293_vm0, %v3056_v21  ;;  %1384 = vmatpush1.bf16.msra.mxu0 %v2581_v22  ;;  %v3064_v22 = vpack.c.bf16 %v85_v18, %v85_v18  ;;  %v2754_v18 = vld [vmem:[#allocation6 + $0x54c] ss:$16 sps:$4 sm:$0xff]  }
  0x82   :  { %1462 = vmatpush1.bf16.msra.mxu1 %v2578_v20  ;;  %1385 = vmatprep.subr.bf16.mxu0 %v2589_v24  ;;  %v2662_v20 = vld [vmem:[#allocation6 + $0x128] ss:$16 sps:$4 sm:$0xff]   ;;  %v2670_v24 = vld [vmem:[#allocation6 + $0x10c] ss:$16 sps:$4 sm:$0xff]  }
  0x83   :  { %1463 = vmatprep.subr.bf16.mxu1 %v2586_v23  ;;  %1493 = vmatprep.mubr.bf16.mxu1 %v3043_v51  ;;  %v2620_v51 = vld [vmem:[#allocation6 + $0x8] ss:$16 sps:$4 sm:$0xff]  }
  0x84   :  { %v2665_v23 = vld [vmem:[#allocation6 + $0x2e8] ss:$16 sps:$4 sm:$0xff]  }
  0x85   :  { %1386 = vmatpush1.bf16.msra.mxu0 %v2587_v26  ;;  %v2668_v26 = vld [vmem:[#allocation6 + $0x108] ss:$16 sps:$4 sm:$0xff]  }
  0x86   :  { %1464 = vmatpush1.bf16.msra.mxu1 %v2584_v25  ;;  %1387 = vmatprep.subr.bf16.mxu0 %v2595_v28  ;;  %v2673_v25 = vld [vmem:[#allocation6 + $0x2cc] ss:$16 sps:$4 sm:$0xff]  }
  0x87   :  { %1465 = vmatprep.subr.bf16.mxu1 %v2592_v27  ;;  %v2671_v27 = vld [vmem:[#allocation6 + $0x2c8] ss:$16 sps:$4 sm:$0xff]   ;;  %v2676_v28 = vld [vmem:[#allocation6 + $0x4ec] ss:$16 sps:$4 sm:$0xff]  }
  0x89   :  { %1388 = vmatpush1.bf16.msra.mxu0 %v2593_v30  ;;  %v2674_v30 = vld [vmem:[#allocation6 + $0x4e8] ss:$16 sps:$4 sm:$0xff]  }
  0x8a   :  { %1466 = vmatpush1.bf16.msra.mxu1 %v2590_v29  ;;  %1389 = vmatprep.subr.bf16.mxu0 %v2601_v32  ;;  %v2679_v29 = vld [vmem:[#allocation6 + $0x2ac] ss:$16 sps:$4 sm:$0xff]  }
  0x8b   :  { %1467 = vmatprep.subr.bf16.mxu1 %v2598_v31  ;;  %v2677_v31 = vld [vmem:[#allocation6 + $0x2a8] ss:$16 sps:$4 sm:$0xff]   ;;  %v2682_v32 = vld [vmem:[#allocation6 + $0x4cc] ss:$16 sps:$4 sm:$0xff]  }
  0x8d   :  { %1390 = vmatpush1.bf16.msra.mxu0 %v2599_v34  ;;  %v2680_v34 = vld [vmem:[#allocation6 + $0x4c8] ss:$16 sps:$4 sm:$0xff]  }
  0x8e   :  { %1468 = vmatpush1.bf16.msra.mxu1 %v2596_v33  ;;  %1391 = vmatprep.subr.bf16.mxu0 %v2607_v36  ;;  %v2685_v33 = vld [vmem:[#allocation6 + $0x28c] ss:$16 sps:$4 sm:$0xff]  }
  0x8f   :  { %1469 = vmatprep.subr.bf16.mxu1 %v2604_v35  ;;  %v2683_v35 = vld [vmem:[#allocation6 + $0x288] ss:$16 sps:$4 sm:$0xff]   ;;  %v2688_v36 = vld [vmem:[#allocation6 + $0x4ac] ss:$16 sps:$4 sm:$0xff]  }
  0x91   :  { %1392 = vmatpush1.bf16.msra.mxu0 %v2605_v40  ;;  %v2694_v40 = vld [vmem:[#allocation6 + $0x48c] ss:$16 sps:$4 sm:$0xff]  }
  0x92   :  { %1470 = vmatpush1.bf16.msra.mxu1 %v2602_v39  ;;  %1393 = vmatprep.subr.bf16.mxu0 %v2613_v42  ;;  %v2686_v39 = vld [vmem:[#allocation6 + $0x4a8] ss:$16 sps:$4 sm:$0xff]  }
  0x93   :  { %1471 = vmatprep.subr.bf16.mxu1 %v2610_v41  ;;  %v2697_v41 = vld [vmem:[#allocation6 + $0x24c] ss:$16 sps:$4 sm:$0xff]   ;;  %v2692_v42 = vld [vmem:[#allocation6 + $0x488] ss:$16 sps:$4 sm:$0xff]  }
  0x95   :  { %1394 = vmatpush1.bf16.msra.mxu0 %v2611_v44  ;;  %v2703_v44 = vld [vmem:[#allocation6 + $0x22c] ss:$16 sps:$4 sm:$0xff]  }
  0x96   :  { %1472 = vmatpush1.bf16.msra.mxu1 %v2608_v43  ;;  %1395 = vmatprep.subr.bf16.mxu0 %v2619_v46  ;;  %v2700_v43 = vld [vmem:[#allocation6 + $0x46c] ss:$16 sps:$4 sm:$0xff]   ;;  %v2701_v46 = vld [vmem:[#allocation6 + $0x228] ss:$16 sps:$4 sm:$0xff]  }
  0x97   :  { %1473 = vmatprep.subr.bf16.mxu1 %v2616_v45  ;;  %v2698_v45 = vld [vmem:[#allocation6 + $0x468] ss:$16 sps:$4 sm:$0xff]  }
  0x99   :  { %1396 = vmatpush2.bf16.msra.mxu0 %v2617_v48  ;;  %v2704_v48 = vld [vmem:[#allocation6 + $0x448] ss:$16 sps:$4 sm:$0xff]  }
  0x9a   :  { %1474 = vmatpush1.bf16.msra.mxu1 %v2614_v47  ;;  %1397 = vmatprep.subr.bf16.mxu0 %v2625_v50  ;;  %v2709_v47 = vld [vmem:[#allocation6 + $0x20c] ss:$16 sps:$4 sm:$0xff]  }
  0x9b   :  { %1475 = vmatprep.subr.bf16.mxu1 %v2622_v49  ;;  %v2707_v49 = vld [vmem:[#allocation6 + $0x208] ss:$16 sps:$4 sm:$0xff]   ;;  %v2712_v50 = vld [vmem:[#allocation6 + $0x42c] ss:$16 sps:$4 sm:$0xff]  }
  0x9d   :  { %1398 = vmatpush2.bf16.msra.mxu0 %v2623_v52  ;;  %v2710_v52 = vld [vmem:[#allocation6 + $0x428] ss:$16 sps:$4 sm:$0xff]  }
  0x9e   :  { %1476 = vmatpush1.bf16.msra.mxu1 %v2620_v51  ;;  %1399 = vmatprep.subr.bf16.mxu0 %v2631_v55  ;;  %v2715_v51 = vld [vmem:[#allocation6 + $0x3ec] ss:$16 sps:$4 sm:$0xff]  }
  0x9f   :  { %1477 = vmatprep.subr.bf16.mxu1 %v2628_v53  ;;  %v2713_v53 = vld [vmem:[#allocation6 + $0x3e8] ss:$16 sps:$4 sm:$0xff]   ;;  %v2718_v55 = vld [vmem:[#allocation6 + $0x40c] ss:$16 sps:$4 sm:$0xff]  }
  0xa1   :  { %1400 = vmatpush2.bf16.msra.mxu0 %v2629_v57  ;;  %v2716_v57 = vld [vmem:[#allocation6 + $0x408] ss:$16 sps:$4 sm:$0xff]  }
  0xa2   :  { %1478 = vmatpush2.bf16.msra.mxu1 %v2626_v56  ;;  %1401 = vmatprep.subr.bf16.mxu0 %v2637_v59  ;;  %v2721_v56 = vld [vmem:[#allocation6 + $0x3cc] ss:$16 sps:$4 sm:$0xff]  }
  0xa3   :  { %1479 = vmatprep.subr.bf16.mxu1 %v2634_v58  ;;  %v2719_v58 = vld [vmem:[#allocation6 + $0x3c8] ss:$16 sps:$4 sm:$0xff]   ;;  %v2724_v59 = vld [vmem:[#allocation6 + $0x5ec] ss:$16 sps:$4 sm:$0xff]  }
  0xa5   :  { %1402 = vmatpush2.bf16.msra.mxu0 %v2635_v61  ;;  %v2722_v61 = vld [vmem:[#allocation6 + $0x5e8] ss:$16 sps:$4 sm:$0xff]  }
  0xa6   :  { %1480 = vmatpush2.bf16.msra.mxu1 %v2632_v60  ;;  %1403 = vmatprep.subr.bf16.mxu0 %v2643_v63  ;;  %v2727_v60 = vld [vmem:[#allocation6 + $0x3ac] ss:$16 sps:$4 sm:$0xff]  }
  0xa7   :  { %1481 = vmatprep.subr.bf16.mxu1 %v2640_v62  ;;  %v2725_v62 = vld [vmem:[#allocation6 + $0x3a8] ss:$16 sps:$4 sm:$0xff]   ;;  %v2730_v63 = vld [vmem:[#allocation6 + $0x5cc] ss:$16 sps:$4 sm:$0xff]  }
  0xa9   :  { %1404 = vmatpush2.bf16.msra.mxu0 %v2641_v2  ;;  %v2728_v2 = vld [vmem:[#allocation6 + $0x5c8] ss:$16 sps:$4 sm:$0xff]  }
  0xaa   :  { %1482 = vmatpush2.bf16.msra.mxu1 %v2638_v0  ;;  %1405 = vmatprep.subr.bf16.mxu0 %v2649_v4  ;;  %v2733_v0 = vld [vmem:[#allocation6 + $0x38c] ss:$16 sps:$4 sm:$0xff]  }
  0xab   :  { %1483 = vmatprep.subr.bf16.mxu1 %v2646_v3  ;;  %v2731_v3 = vld [vmem:[#allocation6 + $0x388] ss:$16 sps:$4 sm:$0xff]   ;;  %v2736_v4 = vld [vmem:[#allocation6 + $0x5ac] ss:$16 sps:$4 sm:$0xff]  }
  0xad   :  { %1406 = vmatpush2.bf16.msra.mxu0 %v2647_v6  ;;  %v2734_v6 = vld [vmem:[#allocation6 + $0x5a8] ss:$16 sps:$4 sm:$0xff]  }
  0xae   :  { %1484 = vmatpush2.bf16.msra.mxu1 %v2644_v5  ;;  %1407 = vmatprep.subr.bf16.mxu0 %v2655_v8  ;;  %v2739_v5 = vld [vmem:[#allocation6 + $0x36c] ss:$16 sps:$4 sm:$0xff]  }
  0xaf   :  { %1485 = vmatprep.subr.bf16.mxu1 %v2652_v7  ;;  %v2737_v7 = vld [vmem:[#allocation6 + $0x368] ss:$16 sps:$4 sm:$0xff]   ;;  %v2742_v8 = vld [vmem:[#allocation6 + $0x58c] ss:$16 sps:$4 sm:$0xff]  }
  0xb1   :  { %1408 = vmatpush2.bf16.msra.mxu0 %v2653_v10  ;;  %v2740_v10 = vld [vmem:[#allocation6 + $0x588] ss:$16 sps:$4 sm:$0xff]  }
  0xb2   :  { %1486 = vmatpush2.bf16.msra.mxu1 %v2650_v9  ;;  %1409 = vmatprep.subr.bf16.mxu0 %v2661_v14  ;;  %v2745_v9 = vld [vmem:[#allocation6 + $0x34c] ss:$16 sps:$4 sm:$0xff]  }
  0xb3   :  { %1487 = vmatprep.subr.bf16.mxu1 %v2658_v13  ;;  %v2743_v13 = vld [vmem:[#allocation6 + $0x348] ss:$16 sps:$4 sm:$0xff]   ;;  %v2748_v14 = vld [vmem:[#allocation6 + $0x56c] ss:$16 sps:$4 sm:$0xff]  }
  0xb5   :  { %1410 = vmatpush2.bf16.msra.mxu0 %v2659_v16  ;;  %v2746_v16 = vld [vmem:[#allocation6 + $0x568] ss:$16 sps:$4 sm:$0xff]  }
  0xb6   :  { %1488 = vmatpush2.bf16.msra.mxu1 %v2656_v15  ;;  %1502 = vmatprep.subr.bf16.mxu0 %v2667_v19  ;;  %v2751_v15 = vld [vmem:[#allocation6 + $0x32c] ss:$16 sps:$4 sm:$0xff]  }
  0xb7   :  { %1489 = vmatprep.subr.bf16.mxu1 %v2664_v17  ;;  %v2749_v17 = vld [vmem:[#allocation6 + $0x328] ss:$16 sps:$4 sm:$0xff]   ;;  %v2757_v19 = vld [vmem:[#allocation6 + $0x30c] ss:$16 sps:$4 sm:$0xff]  }
  0xb8   :  { %1412 = vmatmul.mubr.bf16.vlgmr.msra.gmra.mxu0 %v3064_v22 }
  0xb9   :  { %1503 = vmatpush1.bf16.msra.mxu0 %v2665_v23  ;;  %1534 = vmatprep.mubr.bf16.mxu0 %v3045_v54  ;;  %v2689_v54 = vld [vmem:[#allocation6 + $0x268] ss:$16 sps:$4 sm:$0xff]  }
  0xba   :  { %1490 = vmatpush2.bf16.msra.mxu1 %v2662_v20  ;;  %1504 = vmatprep.subr.bf16.mxu0 %v2673_v25  ;;  %v2752_v20 = vld [vmem:[#allocation6 + $0x548] ss:$16 sps:$4 sm:$0xff]   ;;  %v2763_v25 = vld [vmem:[#allocation6 + $0x60c] ss:$16 sps:$4 sm:$0xff]  }
  0xbb   :  { %1491 = vmatprep.subr.bf16.mxu1 %v2670_v24  ;;  %v2755_v23 = vld [vmem:[#allocation6 + $0x308] ss:$16 sps:$4 sm:$0xff]   ;;  %v2760_v24 = vld [vmem:[#allocation6 + $0x52c] ss:$16 sps:$4 sm:$0xff]  }
  0xbd   :  { %1505 = vmatpush1.bf16.msra.mxu0 %v2671_v27  ;;  %v2761_v27 = vld [vmem:[#allocation6 + $0x608] ss:$16 sps:$4 sm:$0xff]  }
  0xbe   :  { %1492 = vmatpush2.bf16.msra.mxu1 %v2668_v26  ;;  %1506 = vmatprep.subr.bf16.mxu0 %v2679_v29  ;;  %v2758_v26 = vld [vmem:[#allocation6 + $0x528] ss:$16 sps:$4 sm:$0xff]  }
  0xbf   :  { %1543 = vmatprep.subr.bf16.mxu1 %v2676_v28  ;;  %v2766_v28 = vld [vmem:[#allocation6 + $0x50c] ss:$16 sps:$4 sm:$0xff]   ;;  %v2769_v29 = vld [vmem:[#allocation9 + $0x74] ss:$8 sps:$4 sm:$0xff]  }
  0xc1   :  { %1494 = vmatmul.mubr.bf16.vlgmr.msra.gmra.mxu1 %v3049_v11  ;;  %1507 = vmatpush1.bf16.msra.mxu0 %v2677_v31  ;;  %v2695_v11 = vld [vmem:[#allocation6 + $0x248] ss:$16 sps:$4 sm:$0xff]   ;;  %v2767_v31 = vld [vmem:[#allocation9 + $0x70] ss:$8 sps:$4 sm:$0xff]  }
  0xc2   :  { %1544 = vmatpush1.bf16.msra.mxu1 %v2674_v30  ;;  %1508 = vmatprep.subr.bf16.mxu0 %v2685_v33  ;;  %v2764_v30 = vld [vmem:[#allocation6 + $0x508] ss:$16 sps:$4 sm:$0xff]   ;;  %v2770_v33 = vld [vmem:[#allocation9 + $0x60] ss:$8 sps:$4 sm:$0xff]  }
  0xc3   :  { %1545 = vmatprep.subr.bf16.mxu1 %v2682_v32  ;;  %1575 = vmatprep.mubr.bf16.mxu1 %v3061_v38  ;;  %v2706_v38 = vld [vmem:[#allocation6 + $0x44c] ss:$16 sps:$4 sm:$0xff]   ;;  %v2772_v32 = vld [vmem:[#allocation9 + $0x64] ss:$8 sps:$4 sm:$0xff]  }
  0xc5   :  { %1509 = vmatpush1.bf16.msra.mxu0 %v2683_v35  ;;  %v2778_v35 = vld [vmem:[#allocation9 + $0x44] ss:$8 sps:$4 sm:$0xff]  }
  0xc6   :  { %1546 = vmatpush1.bf16.msra.mxu1 %v2680_v34  ;;  %1510 = vmatprep.subr.bf16.mxu0 %v2691_v37  ;;  %v2775_v34 = vld [vmem:[#allocation9 + $0x54] ss:$8 sps:$4 sm:$0xff]  }
  0xc7   :  { %1547 = vmatprep.subr.bf16.mxu1 %v2688_v36  ;;  %v2815_v36 = vld [vmem:[#allocation9 + $0x170] ss:$8 sps:$4 sm:$0xff]   ;;  %v2817_v37 = vld [vmem:[#allocation9 + $0x174] ss:$8 sps:$4 sm:$0xff]  }
  0xc9   :  { %1511 = vmatpush1.bf16.msra.mxu0 %v2689_v54  ;;  %v2818_v54 = vld [vmem:[#allocation9 + $0x160] ss:$8 sps:$4 sm:$0xff]  }
  0xca   :  { %1548 = vmatpush1.bf16.msra.mxu1 %v2686_v39  ;;  %1512 = vmatprep.subr.bf16.mxu0 %v2697_v41  ;;  %v2776_v39 = vld [vmem:[#allocation9 + $0x40] ss:$8 sps:$4 sm:$0xff]   ;;  %v2821_v41 = vld [vmem:[#allocation9 + $0x150] ss:$8 sps:$4 sm:$0xff]  }
  0xcb   :  { %1549 = vmatprep.subr.bf16.mxu1 %v2694_v40  ;;  %v2779_v40 = vld [vmem:[#allocation9 + $0x30] ss:$8 sps:$4 sm:$0xff]  }
  0xcd   :  { %1513 = vmatpush1.bf16.msra.mxu0 %v2695_v11  ;;  %v2826_v11 = vld [vmem:[#allocation9 + $0x144] ss:$8 sps:$4 sm:$0xff]  }
  0xce   :  { %1550 = vmatpush1.bf16.msra.mxu1 %v2692_v42  ;;  %1514 = vmatprep.subr.bf16.mxu0 %v2703_v44  ;;  %v2784_v42 = vld [vmem:[#allocation9 + $0x24] ss:$8 sps:$4 sm:$0xff]   ;;  %v2824_v44 = vld [vmem:[#allocation9 + $0x140] ss:$8 sps:$4 sm:$0xff]  }
  0xcf   :  { %1551 = vmatprep.subr.bf16.mxu1 %v2700_v43  ;;  %v2782_v43 = vld [vmem:[#allocation9 + $0x20] ss:$8 sps:$4 sm:$0xff]  }
  0xd1   :  { %1515 = vmatpush1.bf16.msra.mxu0 %v2701_v46  ;;  %v2829_v46 = vld [vmem:[#allocation9 + $0x134] ss:$8 sps:$4 sm:$0xff]  }
  0xd2   :  { %1552 = vmatpush1.bf16.msra.mxu1 %v2698_v45  ;;  %1516 = vmatprep.subr.bf16.mxu0 %v2709_v47  ;;  %v2787_v45 = vld [vmem:[#allocation9 + $0x14] ss:$8 sps:$4 sm:$0xff]   ;;  %v2827_v47 = vld [vmem:[#allocation9 + $0x130] ss:$8 sps:$4 sm:$0xff]  }
  0xd3   :  { %1553 = vmatprep.subr.bf16.mxu1 %v2706_v38  ;;  %v2785_v38 = vld [vmem:[#allocation9 + $0x10] ss:$8 sps:$4 sm:$0xff]  }
  0xd5   :  { %1517 = vmatpush1.bf16.msra.mxu0 %v2707_v49  ;;  %v2832_v49 = vld [vmem:[#allocation9 + $0x124] ss:$8 sps:$4 sm:$0xff]  }
  0xd6   :  { %1554 = vmatpush1.bf16.msra.mxu1 %v2704_v48  ;;  %1518 = vmatprep.subr.bf16.mxu0 %v2715_v51  ;;  %v2790_v48 = vld [vmem:[#allocation9 + $0x4] ss:$8 sps:$4 sm:$0xff]   ;;  %v2830_v51 = vld [vmem:[#allocation9 + $0x120] ss:$8 sps:$4 sm:$0xff]  }
  0xd7   :  { %1555 = vmatprep.subr.bf16.mxu1 %v2712_v50  ;;  %v2788_v50 = vld [vmem:[#allocation9] ss:$8 sps:$4 sm:$0xff]  }
  0xd9   :  { %1519 = vmatpush2.bf16.msra.mxu0 %v2713_v53  ;;  %v2835_v53 = vld [vmem:[#allocation9 + $0x114] ss:$8 sps:$4 sm:$0xff]  }
  0xda   :  { %1556 = vmatpush1.bf16.msra.mxu1 %v2710_v52  ;;  %1520 = vmatprep.subr.bf16.mxu0 %v2721_v56  ;;  %v2793_v52 = vld [vmem:[#allocation9 + $0xf4] ss:$8 sps:$4 sm:$0xff]   ;;  %v2833_v56 = vld [vmem:[#allocation9 + $0x110] ss:$8 sps:$4 sm:$0xff]  }
  0xdb   :  { %1557 = vmatprep.subr.bf16.mxu1 %v2718_v55  ;;  %v2791_v55 = vld [vmem:[#allocation9 + $0xf0] ss:$8 sps:$4 sm:$0xff]  }
  0xdd   :  { %1521 = vmatpush2.bf16.msra.mxu0 %v2719_v58  ;;  %v2838_v58 = vld [vmem:[#allocation9 + $0x104] ss:$8 sps:$4 sm:$0xff]  }
  0xde   :  { %1558 = vmatpush1.bf16.msra.mxu1 %v2716_v57  ;;  %1522 = vmatprep.subr.bf16.mxu0 %v2727_v60  ;;  %v2796_v57 = vld [vmem:[#allocation9 + $0xe4] ss:$8 sps:$4 sm:$0xff]   ;;  %v2836_v60 = vld [vmem:[#allocation9 + $0x100] ss:$8 sps:$4 sm:$0xff]  }
  0xdf   :  { %1559 = vmatprep.subr.bf16.mxu1 %v2724_v59  ;;  %v2794_v59 = vld [vmem:[#allocation9 + $0xe0] ss:$8 sps:$4 sm:$0xff]  }
  0xe1   :  { %1523 = vmatpush2.bf16.msra.mxu0 %v2725_v62  ;;  %v2841_v62 = vld [vmem:[#allocation9 + $0x1f4] ss:$8 sps:$4 sm:$0xff]  }
  0xe2   :  { %1560 = vmatpush2.bf16.msra.mxu1 %v2722_v61  ;;  %1524 = vmatprep.subr.bf16.mxu0 %v2733_v0  ;;  %v2799_v61 = vld [vmem:[#allocation9 + $0xd4] ss:$8 sps:$4 sm:$0xff]   ;;  %v2839_v0 = vld [vmem:[#allocation9 + $0x1f0] ss:$8 sps:$4 sm:$0xff]  }
  0xe3   :  { %1561 = vmatprep.subr.bf16.mxu1 %v2730_v63  ;;  %v2797_v63 = vld [vmem:[#allocation9 + $0xd0] ss:$8 sps:$4 sm:$0xff]  }
  0xe5   :  { %1525 = vmatpush2.bf16.msra.mxu0 %v2731_v3  ;;  %v2844_v3 = vld [vmem:[#allocation9 + $0x1e4] ss:$8 sps:$4 sm:$0xff]  }
  0xe6   :  { %1562 = vmatpush2.bf16.msra.mxu1 %v2728_v2  ;;  %1526 = vmatprep.subr.bf16.mxu0 %v2739_v5  ;;  %v2802_v2 = vld [vmem:[#allocation9 + $0xc4] ss:$8 sps:$4 sm:$0xff]   ;;  %v2842_v5 = vld [vmem:[#allocation9 + $0x1e0] ss:$8 sps:$4 sm:$0xff]  }
  0xe7   :  { %1563 = vmatprep.subr.bf16.mxu1 %v2736_v4  ;;  %v2800_v4 = vld [vmem:[#allocation9 + $0xc0] ss:$8 sps:$4 sm:$0xff]  }
  0xe9   :  { %1527 = vmatpush2.bf16.msra.mxu0 %v2737_v7  ;;  %v2847_v7 = vld [vmem:[#allocation9 + $0x1d4] ss:$8 sps:$4 sm:$0xff]  }
  0xea   :  { %1564 = vmatpush2.bf16.msra.mxu1 %v2734_v6  ;;  %1528 = vmatprep.subr.bf16.mxu0 %v2745_v9  ;;  %v2805_v6 = vld [vmem:[#allocation9 + $0xb4] ss:$8 sps:$4 sm:$0xff]   ;;  %v2845_v9 = vld [vmem:[#allocation9 + $0x1d0] ss:$8 sps:$4 sm:$0xff]  }
  0xeb   :  { %1565 = vmatprep.subr.bf16.mxu1 %v2742_v8  ;;  %v2803_v8 = vld [vmem:[#allocation9 + $0xb0] ss:$8 sps:$4 sm:$0xff]  }
  0xed   :  { %1529 = vmatpush2.bf16.msra.mxu0 %v2743_v13  ;;  %v2850_v13 = vld [vmem:[#allocation9 + $0x1c4] ss:$8 sps:$4 sm:$0xff]  }
  0xee   :  { %1566 = vmatpush2.bf16.msra.mxu1 %v2740_v10  ;;  %1530 = vmatprep.subr.bf16.mxu0 %v2751_v15  ;;  %v2808_v10 = vld [vmem:[#allocation9 + $0xa4] ss:$8 sps:$4 sm:$0xff]   ;;  %v2848_v15 = vld [vmem:[#allocation9 + $0x1c0] ss:$8 sps:$4 sm:$0xff]  }
  0xef   :  { %1567 = vmatprep.subr.bf16.mxu1 %v2748_v14  ;;  %v2806_v14 = vld [vmem:[#allocation9 + $0xa0] ss:$8 sps:$4 sm:$0xff]  }
  0xf1   :  { %1531 = vmatpush2.bf16.msra.mxu0 %v2749_v17  ;;  %v2809_v17 = vld [vmem:[#allocation9 + $0x90] ss:$8 sps:$4 sm:$0xff]  }
  0xf2   :  { %1568 = vmatpush2.bf16.msra.mxu1 %v2746_v16  ;;  %1532 = vmatprep.subr.bf16.mxu0 %v2757_v19  ;;  %v2811_v16 = vld [vmem:[#allocation9 + $0x94] ss:$8 sps:$4 sm:$0xff]  }
  0xf3   :  { %1569 = vmatprep.subr.bf16.mxu1 %v2754_v18  ;;  %v2814_v18 = vld [vmem:[#allocation9 + $0x84] ss:$8 sps:$4 sm:$0xff]  }
  0xf5   :  { %1533 = vmatpush2.bf16.msra.mxu0 %v2755_v23  ;;  %v2812_v23 = vld [vmem:[#allocation9 + $0x80] ss:$8 sps:$4 sm:$0xff]  }
  0xf6   :  { %1570 = vmatpush2.bf16.msra.mxu1 %v2752_v20  ;;  %1598 = vmatprep.subr.bf16.mxu0 %v2763_v25 }
  0xf7   :  { %1571 = vmatprep.subr.bf16.mxu1 %v2760_v24 }
  0xf8   :  { %1535 = vmatmul.mubr.bf16.vlgmr.msra.gmra.mxu0 %v3051_v12  ;;  %v2773_v12 = vld [vmem:[#allocation9 + $0x50] ss:$8 sps:$4 sm:$0xff]  }
  0xf9   :  { %1599 = vmatpush1.bf16.msra.mxu0 %v2761_v27  ;;  %1616 = vmatprep.mubr.bf16.mxu0 %v2985_v1  ;;  %v2820_v1 = vld [vmem:[#allocation9 + $0x164] ss:$8 sps:$4 sm:$0xff]   ;;  %v2851_v27 = vld [vmem:[#allocation9 + $0x1b0] ss:$8 sps:$4 sm:$0xff]  }
  0xfa   :  { %1572 = vmatpush2.bf16.msra.mxu1 %v2758_v26  ;;  %2029 = vmatprep.subr.bf16.mxu0 %v2769_v29  ;;  %v2853_v26 = vld [vmem:[#allocation9 + $0x1b4] ss:$8 sps:$4 sm:$0xff]  }
  0xfb   :  { %1573 = vmatprep.subr.bf16.mxu1 %v2766_v28 }
  0xfe   :  { %1574 = vmatpush2.bf16.msra.mxu1 %v2764_v30 }
  0xff   :  { %2070 = vmatprep.subr.bf16.mxu1 %v2817_v37 }
 0x100   :  { %2395 = vmatmul.mubr.msk.bf16.vlgmr.msra.gmra.mxu0 %vm1293_vm0, %v3056_v21  ;;  %v2823_v21 = vld [vmem:[#allocation9 + $0x154] ss:$8 sps:$4 sm:$0xff]  }
 0x101   :  { %1576 = vmatmul.mubr.bf16.vlgmr.msra.gmra.mxu1 %v3064_v22  ;;  %2030 = vmatpush1.bf16.msra.mxu0 %v2767_v31  ;;  %v2781_v22 = vld [vmem:[#allocation9 + $0x34] ss:$8 sps:$4 sm:$0xff]  }
 0x102   :  { %2031 = vmatprep.subr.bf16.mxu0 %v2772_v32  ;;  %2071 = vmatpush1.bf16.msra.mxu1 %v2815_v36  ;;  %v2856_v32 = vld [vmem:[#allocation9 + $0x1a4] ss:$8 sps:$4 sm:$0xff]   ;;  %v2857_v36 = vld [vmem:[#allocation9 + $0x190] ss:$8 sps:$4 sm:$0xff]  }
 0x103   :  { %2072 = vmatprep.subr.bf16.mxu1 %v2820_v1 }
 0x105   :  { %2032 = vmatpush1.bf16.msra.mxu0 %v2770_v33  ;;  %v2854_v33 = vld [vmem:[#allocation9 + $0x1a0] ss:$8 sps:$4 sm:$0xff]  }
 0x106   :  { %2033 = vmatprep.subr.bf16.mxu0 %v2775_v34  ;;  %2073 = vmatpush1.bf16.msra.mxu1 %v2818_v54  ;;  %v2860_v54 = vld [vmem:[#allocation9 + $0x180] ss:$8 sps:$4 sm:$0xff]  }
 0x107   :  { %2074 = vmatprep.subr.bf16.mxu1 %v2823_v21 }
 0x109   :  { %2034 = vmatpush1.bf16.msra.mxu0 %v2773_v12 }
 0x10a   :  { %2035 = vmatprep.subr.bf16.mxu0 %v2778_v35  ;;  %2075 = vmatpush1.bf16.msra.mxu1 %v2821_v41  ;;  %v2859_v35 = vld [vmem:[#allocation9 + $0x194] ss:$8 sps:$4 sm:$0xff]  }
 0x10b   :  { %2076 = vmatprep.subr.bf16.mxu1 %v2826_v11  ;;  %v291_v41 = vld [vmem:[#allocation8] sm:$0xf] }
 0x10d   :  { %2036 = vmatpush1.bf16.msra.mxu0 %v2776_v39  ;;  %v2862_v39 = vld [vmem:[#allocation9 + $0x184] ss:$8 sps:$4 sm:$0xff]  }
 0x10e   :  { %2037 = vmatprep.subr.bf16.mxu0 %v2781_v22  ;;  %2077 = vmatpush1.bf16.msra.mxu1 %v2824_v44  ;;  %v293_v22 = vlaneseq }
 0x10f   :  { %2078 = vmatprep.subr.bf16.mxu1 %v2829_v46 }
 0x110   :  { %v3075_v21 = vshrl.u32 %v293_v22, 7 }
 0x111   :  { %2038 = vmatpush1.bf16.msra.mxu0 %v2779_v40 }
 0x112   :  { %2039 = vmatprep.subr.bf16.mxu0 %v2784_v42  ;;  %2079 = vmatpush1.bf16.msra.mxu1 %v2827_v47  ;;  %v3078_v40 = vsub.s32 0, %v3075_v21  ;;  %v299_v42 = vsub.s32 1, %v3075_v21 }
 0x113   :  { %2080 = vmatprep.subr.bf16.mxu1 %v2832_v49 }
 0x114   :  { %v296_v11 = vrot.slane %v291_v41, %v3078_v40 }
 0x115   :  { %2040 = vmatpush1.bf16.msra.mxu0 %v2782_v43  ;;  %v300_v43 = vrot.slane %v291_v41, %v299_v42 }
 0x116   :  { %2041 = vmatprep.subr.bf16.mxu0 %v2787_v45  ;;  %2081 = vmatpush1.bf16.msra.mxu1 %v2830_v51 }
 0x117   :  { %2082 = vmatprep.subr.bf16.mxu1 %v2835_v53 }
 0x119   :  { %2042 = vmatpush1.bf16.msra.mxu0 %v2785_v38 }
 0x11a   :  { %2043 = vmatprep.subr.bf16.mxu0 %v2790_v48  ;;  %2083 = vmatpush1.bf16.msra.mxu1 %v2833_v56 }
 0x11b   :  { %2084 = vmatprep.subr.bf16.mxu1 %v2838_v58 }
 0x11d   :  { %2044 = vmatpush1.bf16.msra.mxu0 %v2788_v50 }
 0x11e   :  { %2045 = vmatprep.subr.bf16.mxu0 %v2793_v52  ;;  %2085 = vmatpush1.bf16.msra.mxu1 %v2836_v60 }
 0x11f   :  { %2086 = vmatprep.subr.bf16.mxu1 %v2841_v62 }
 0x121   :  { %2046 = vmatpush2.bf16.msra.mxu0 %v2791_v55 }
 0x122   :  { %2047 = vmatprep.subr.bf16.mxu0 %v2796_v57  ;;  %2087 = vmatpush2.bf16.msra.mxu1 %v2839_v0  ;;  %v303_v0 = vsub.s32 2, %v3075_v21 }
 0x123   :  { %2088 = vmatprep.subr.bf16.mxu1 %v2844_v3 }
 0x125   :  { %2048 = vmatpush2.bf16.msra.mxu0 %v2794_v59 }
 0x126   :  { %2049 = vmatprep.subr.bf16.mxu0 %v2799_v61  ;;  %2089 = vmatpush2.bf16.msra.mxu1 %v2842_v5 }
 0x127   :  { %2090 = vmatprep.subr.bf16.mxu1 %v2847_v7 }
 0x129   :  { %2050 = vmatpush2.bf16.msra.mxu0 %v2797_v63 }
 0x12a   :  { %2051 = vmatprep.subr.bf16.mxu0 %v2802_v2  ;;  %2091 = vmatpush2.bf16.msra.mxu1 %v2845_v9  ;;  %v307_v2 = vsub.s32 3, %v3075_v21 }
 0x12b   :  { %2092 = vmatprep.subr.bf16.mxu1 %v2850_v13 }
 0x12d   :  { %2052 = vmatpush2.bf16.msra.mxu0 %v2800_v4  ;;  %v304_v4 = vrot.slane %v291_v41, %v303_v0 }
 0x12e   :  { %2053 = vmatprep.subr.bf16.mxu0 %v2805_v6  ;;  %2093 = vmatpush2.bf16.msra.mxu1 %v2848_v15  ;;  %v308_v6 = vrot.slane %v291_v41, %v307_v2 }
 0x12f   :  { %2094 = vmatprep.subr.bf16.mxu1 %v2853_v26 }
 0x131   :  { %2054 = vmatpush2.bf16.msra.mxu0 %v2803_v8 }
 0x132   :  { %2055 = vmatprep.subr.bf16.mxu0 %v2808_v10  ;;  %2095 = vmatpush2.bf16.msra.mxu1 %v2851_v27 }
 0x133   :  { %2096 = vmatprep.subr.bf16.mxu1 %v2856_v32 }
 0x135   :  { %2056 = vmatpush2.bf16.msra.mxu0 %v2806_v14 }
 0x136   :  { %2057 = vmatprep.subr.bf16.mxu0 %v2811_v16  ;;  %2097 = vmatpush2.bf16.msra.mxu1 %v2854_v33  ;;  %v2115_v33 = vld [vmem:[%s3104_s5] sm:$0xff] }
 0x137   :  { %2098 = vmatprep.subr.bf16.mxu1 %v2859_v35 }
 0x138   :  { %v1331_v19 = vpop.f32.mrf.mxu0 }
 0x139   :  { %v1372_v20 = vpop.f32.mrf.mxu1  ;;  %2058 = vmatpush2.bf16.msra.mxu0 %v2809_v17  ;;  %v1332_v44 = vadd.f32 %v1331_v19, %v296_v11 }
 0x13a   :  { %v1333_v24 = vpop.f32.mrf.mxu0  ;;  %2059 = vmatprep.subr.bf16.mxu0 %v2814_v18  ;;  %2099 = vmatpush2.bf16.msra.mxu1 %v2857_v36 }
 0x13b   :  { %v1374_v25 = vpop.f32.mrf.mxu1  ;;  %2100 = vmatprep.subr.bf16.mxu1 %v2862_v39  ;;  %v1334_v45 = vadd.f32 %v1333_v24, %v300_v43  ;;  %v1373_v46 = vadd.f32 %v1372_v20, %v1332_v44  ;;  %v1697_v39 = vld [vmem:[%s3103_s4] sm:$0x3]  ;;  %s2986_s4 = smov [#allocation11]  }
 0x13c   :  { %v1335_v28 = vpop.f32.mrf.mxu0  ;;  %v1706_v22 = vrot.slane %v1697_v39, %v299_v42  ;;  %s2187_s5 = sshll.u32 %s2986_s4, 4  ;;  %s2188_s5 = int_to_ptr.vmem [resolvable:$true] %s2187_s5 }
 0x13d   :  { %v1376_v29 = vpop.f32.mrf.mxu1  ;;  %2060 = vmatpush2.bf16.msra.mxu0 %v2812_v23  ;;  %v1375_v47 = vadd.f32 %v1374_v25, %v1334_v45  ;;  %s2949_s26 = scalar_lea.vmem %s2188_s5, 16  ;;  %s2953_s27 = scalar_lea.vmem %s2188_s5, 32 }
 0x13e   :  { %v1336_v30 = vpop.f32.mrf.mxu0  ;;  %2101 = vmatpush2.bf16.msra.mxu1 %v2860_v54  ;;  %v1702_v54 = vrot.slane %v1697_v39, %v3078_v40  ;;  %p2950_p6 = scmp.ne.s32.totalorder %s2188_s5, %s2949_s26  ;;  %p2954_p7 = scmp.lt.s32.totalorder %s2188_s5, %s2188_s5 }
 0x13f   :  { %v1377_v31 = vpop.f32.mrf.mxu1  ;;  %p2955_p8 = scmp.lt.s32.totalorder %s2953_s27, %s2949_s26 }
 0x141   :  { %v1454_v34 = vpop.f32.mrf.mxu1  ;;  %p2956_p9 = por %p2955_p8, %p2954_p7 }
 0x143   :  { %v1456_v12 = vpop.f32.mrf.mxu1  ;;  %p2957_p10 = pnand %p2956_p9, %p2950_p6 }
 0x145   :  { %v1458_v37 = vpop.f32.mrf.mxu1 }
 0x147   :  { %v1459_v1 = vpop.f32.mrf.mxu1 }
 0x178   :  { %v1413_v38 = vpop.f32.mrf.mxu0 }
 0x179   :  { %v1414_v48 = vadd.f32 %v1413_v38, %v1373_v46 }
 0x17a   :  { %v1415_v49 = vpop.f32.mrf.mxu0 }
 0x17b   :  { %v1455_v50 = vadd.f32 %v1454_v34, %v1414_v48  ;;  %v1416_v51 = vadd.f32 %v1415_v49, %v1375_v47  ;;  %v2461_v34 = vcombine.high %v2115_v33, %v2115_v33 }
 0x17c   :  { %v1417_v52 = vpop.f32.mrf.mxu0 }
 0x17d   :  { %v1457_v53 = vadd.f32 %v1456_v12, %v1416_v51  ;;  %v1625_v55 = vmax.f32 %v1455_v50, 0.0  ;;  %v2163_v12 = vld [vmem:[#allocation2] sm:$0x1]  ;;  %v2460_v52 = vcombine.low %v2115_v33, %v2115_v33 }
 0x17e   :  { %v1418_v56 = vpop.f32.mrf.mxu0  ;;  %2166 = vperm.xlu0 %2472, %v2163_v12  }
 0x17f   :  { %v1626_v57 = vmax.f32 %v1457_v53, 0.0  ;;  %v1629_v60 = vpack.c.bf16 %v1625_v55, %v1625_v55 }
 0x181   :  { %v1495_v58 = vpop.f32.mrf.mxu1  ;;  %v1630_v59 = vpack.c.bf16 %v1626_v57, %v1626_v57 }
 0x182   :  { %v1496_v8 = vadd.f32 %v1495_v58, %v304_v4 }
 0x183   :  { %v1497_v61 = vpop.f32.mrf.mxu1  ;;  %2061 = vmatprep.mubr.bf16.mxu0 %v1630_v59 }
 0x184   :  { %2062 = vmatmul.mubr.bf16.vlgmr.msra.gmra.mxu0 %v1629_v60  ;;  %v1498_v10 = vadd.f32 %v1497_v61, %v308_v6 }
 0x185   :  { %v1499_v62 = vpop.f32.mrf.mxu1  ;;  %2155 = vmatprep.mubr.bf16.mxu0 %v2461_v34 }
 0x187   :  { %v1500_v63 = vpop.f32.mrf.mxu1 }
 0x1b8   :  { %v1536_v3 = vpop.f32.mrf.mxu0 }
 0x1b9   :  { %v1537_v13 = vadd.f32 %v1536_v3, %v1496_v8 }
 0x1ba   :  { %v1538_v5 = vpop.f32.mrf.mxu0 }
 0x1bb   :  { %v1539_v16 = vadd.f32 %v1538_v5, %v1498_v10 }
 0x1bc   :  { %v1540_v7 = vpop.f32.mrf.mxu0 }
 0x1be   :  { %v1541_v9 = vpop.f32.mrf.mxu0 }
 0x1c0   :  { %v1618_v15 = vpop.f32.mrf.mxu0 }
 0x1c1   :  { %v1577_v14 = vpop.f32.mrf.mxu1 }
 0x1c2   :  { %v1578_v17 = vadd.f32 %v1577_v14, %v1537_v13  ;;  %v1620_v19 = vpop.f32.mrf.mxu0 }
 0x1c3   :  { %v1579_v18 = vpop.f32.mrf.mxu1 }
 0x1c4   :  { %v1619_v20 = vadd.f32 %v1618_v15, %v1578_v17  ;;  %v1580_v23 = vadd.f32 %v1579_v18, %v1539_v16  ;;  %v1622_v25 = vpop.f32.mrf.mxu0 }
 0x1c5   :  { %v1581_v24 = vpop.f32.mrf.mxu1 }
 0x1c6   :  { %v1621_v26 = vadd.f32 %v1620_v19, %v1580_v23  ;;  %v1627_v27 = vmax.f32 %v1619_v20, 0.0  ;;  %v1623_v29 = vpop.f32.mrf.mxu0 }
 0x1c7   :  { %v1582_v28 = vpop.f32.mrf.mxu1 }
 0x1c8   :  { %v1628_v30 = vmax.f32 %v1621_v26, 0.0  ;;  %v1631_v32 = vpack.c.bf16 %v1627_v27, %v1627_v27 }
 0x1ca   :  { %v1632_v31 = vpack.c.bf16 %v1628_v30, %v1628_v30 }
 0x1cc   :  { %2102 = vmatprep.mubr.bf16.mxu1 %v1632_v31 }
 0x1cd   :  { %2103 = vmatmul.mubr.bf16.vlgmr.msra.gmra.mxu1 %v1631_v32 }
 0x1f9   :  { %v2167_v53 = vpop.permute.xlu0 %2166 }
 0x1fa   :  { %v2172_v21 = vrot.slane %v2167_v53, %v3078_v40 }
 0x244   :  { %v2063_v35 = vpop.f32.mrf.mxu0 }
 0x245   :  { %v2064_v41 = vadd.f32 %v2063_v35, %v1702_v54 }
 0x246   :  { %v2065_v36 = vpop.f32.mrf.mxu0 }
 0x247   :  { %v2066_v43 = vadd.f32 %v2065_v36, %v1706_v22 }
 0x248   :  { %v2067_v37 = vpop.f32.mrf.mxu0 }
 0x24a   :  { %v2068_v1 = vpop.f32.mrf.mxu0 }
 0x28d   :  { %v2104_v11 = vpop.f32.mrf.mxu1 }
 0x28e   :  { %v2105_v44 = vadd.f32 %v2104_v11, %v2064_v41 }
 0x28f   :  { %v2106_v45 = vpop.f32.mrf.mxu1 }
 0x290   :  { %v2107_v46 = vadd.f32 %v2106_v45, %v2066_v43  ;;  %v2111_v38 = vmax.f32 %v2105_v44, 0.0 }
 0x291   :  { %v2108_v47 = vpop.f32.mrf.mxu1 }
 0x292   :  { %v2112_v48 = vmax.f32 %v2107_v46, 0.0  ;;  %v2113_v51 = vpack.c.bf16 %v2111_v38, %v2111_v38 }
 0x293   :  { %v2109_v49 = vpop.f32.mrf.mxu1 }
 0x294   :  { %v2114_v50 = vpack.c.bf16 %v2112_v48, %v2112_v48 }
 0x296   :  { %2137 = vmatprep.subr.bf16.mxu0 %v2114_v50 }
 0x297   :  { %2138 = vmatpush1.bf16.xpose.msra.mxu0 %v2113_v51 }
 0x29e   :  { %2156 = vmatmul.mubr.bf16.vlgmr.msra.gmra.mxu0 %v2460_v52 }
 0x35e   :  { %v2157_v42 = vpop.f32.mrf.mxu0 }
 0x35f   :  { %v2173_v55 = vadd.f32 %v2172_v21, %v2157_v42 }
 0x360   :  { %v2159_v56 = vpop.f32.mrf.mxu0 }
 0x361   :  { %v2174_v57 = vsub.f32 0.0, %v2173_v55 }
 0x362   :  { %v2160_v58 = vpop.f32.mrf.mxu0 }
 0x363   :  { %v2175_v59 = vmul.f32 1.442695, %v2174_v57 }
 0x364   :  { %v2161_v60 = vpop.f32.mrf.mxu0 }
 0x365   :  { %2865 = vpow2.f32 %v2175_v59 }
 0x372   :  { %v2866_v61 = vpop.eup %2865 }
 0x373   :  { %v2177_v62 = vadd.f32 1.0, %v2866_v61 }
 0x375   :  { %2867 = vrcp.f32 %v2177_v62 }
 0x382   :  { %v2868_v63 = vpop.eup %2867 }
 0x383   :  { %2180 = vst.msk [vmem:[#allocation11] sm:$0x1] %vm2179_vm1, %v2868_v63 }
 0x384   :  { %2960 = shalt.err (!%p2957_p10)
}
 0x385   :  { %2190 = dma.vmem_to_hbm [thread:$0]  %s2188_s5, 16, %s3106_s7, [#allocation5]  }
 0x386   :  { %2975 = dma.done.wait [#allocation5], 16  }
 0x387   :  { %2976 = vsyncadd [#allocation5], 4294967280 }
 0x388   :  { %2194 = vsyncpa [#allocation4], 1 }
 0x389   :  { %2195 = vsyncpa [#allocation7], 1 }
 0x38a   :  { %2196 = vsyncpa [#allocation10], 1 }
 0x38b   :  { %2197 = vsyncpa [#allocation5], 1 }

</bundles_post_ra>
